<compile_context>
chip_gen: v6e
topology: v6e:2x2x1
jax: 0.10.0
libtpu: 0.0.40
codegen_flags: <defaults>
</compile_context>

<pallas_src>
import jax
import jax.numpy as jnp
from jax.experimental import pallas as pl
from jax.experimental.pallas import tpu as pltpu


def _round_up(x: int, m: int) -> int:
    return (x + m - 1) // m * m


def metricnet_kernel(x_ref, w1_ref, b1_ref, w2_ref, b2_ref, w3_ref, b3_ref, o_ref):
    """Fused 3-layer MLP on one (bm, feat) tile of x.

    Matmuls run on the MXU with bf16 inputs / f32 accumulation; bias-add and
    ReLU stay in f32 on the VPU.  x arrives as f32 and is cast to bf16 here.
    """
    x = x_ref[...].astype(w1_ref.dtype)                          # f32 -> bf16 in-kernel
    h1 = jnp.dot(x, w1_ref[...], preferred_element_type=jnp.float32) + b1_ref[...]
    h1 = jnp.maximum(h1, 0.0)                                    # f32
    h2 = jnp.dot(h1.astype(w2_ref.dtype), w2_ref[...],
                 preferred_element_type=jnp.float32) + b2_ref[...]
    h2 = jnp.maximum(h2, 0.0)                                    # f32
    out = jnp.dot(h2.astype(w3_ref.dtype), w3_ref[...],
                  preferred_element_type=jnp.float32) + b3_ref[...]
    o_ref[...] = out.astype(o_ref.dtype)                         # (bm, 8) narrow store


def init_params(key, in_dim, hidden_size):
    """PyTorch-Linear-style uniform(-1/sqrt(fan_in), 1/sqrt(fan_in)) init.
    Weights stored transposed vs PyTorch: (fan_in, fan_out) so the kernel
    computes x @ W + b directly.  Biases are (1, fan_out)."""
    dims = [(2 * in_dim, hidden_size), (hidden_size, hidden_size), (hidden_size, 2)]
    params = []
    for i, (fan_in, fan_out) in enumerate(dims):
        kw, kb = jax.random.split(jax.random.fold_in(key, i))
        bound = 1.0 / jnp.sqrt(float(fan_in))
        w = jax.random.uniform(kw, (fan_in, fan_out), jnp.float32, -bound, bound)
        b = jax.random.uniform(kb, (1, fan_out), jnp.float32, -bound, bound)
        params.extend([w, b])
    return tuple(params)


def pack_params(params, *, compute_dtype=jnp.bfloat16, lane=128, out_align=8):
    """Zero-pad hidden dims to a multiple of 128 (lane-dense for the MXU) and the
    output dim only to 8 (keeps the HBM write stream at 32 B/row instead of
    512 B/row).  Weights cast to the compute dtype, biases stay f32.  Padded
    hidden/output units get zero weights + zero bias -> contribute nothing, so
    the forward math is unchanged."""
    w1, b1, w2, b2, w3, b3 = params
    fin, h = w1.shape
    o = w3.shape[1]
    hp = _round_up(h, lane)
    op = _round_up(o, out_align)

    w1p = jnp.zeros((fin, hp), jnp.float32).at[:, :h].set(w1).astype(compute_dtype)
    b1p = jnp.zeros((1, hp), jnp.float32).at[:, :h].set(b1)
    w2p = jnp.zeros((hp, hp), jnp.float32).at[:h, :h].set(w2).astype(compute_dtype)
    b2p = jnp.zeros((1, hp), jnp.float32).at[:, :h].set(b2)
    w3p = jnp.zeros((hp, op), jnp.float32).at[:h, :o].set(w3).astype(compute_dtype)
    b3p = jnp.zeros((1, op), jnp.float32).at[:, :o].set(b3)
    return (w1p, b1p, w2p, b2p, w3p, b3p), o


def _pick_block_b(requested, batch, feat, hidden_pad, out_pad,
                  param_bytes, weight_buffers, vmem_budget_bytes):
    """Largest multiple-of-8 batch tile whose true VMEM footprint (double-buffered
    f32 x/out tiles + f32/bf16 intermediates + resident weight buffers) fits the
    budget, capped so the batch still spans >= 4 grid steps (v7x megacore needs
    at least 2 to use both TensorCores)."""
    per_row = (
        2 * feat * 4                  # x tile, f32, double buffered
        + 2 * out_pad * 4             # out tile, f32, double buffered
        + feat * 2                    # bf16 cast of x
        + 2 * hidden_pad * (4 + 2)    # h1/h2 in f32 + their bf16 casts
        + out_pad * 4                 # pre-store f32 output
    )
    fixed = weight_buffers * param_bytes
    avail = max(vmem_budget_bytes - fixed, per_row * 8)
    bm_cap = max(8, (avail // per_row) // 8 * 8)
    bm = max(8, (min(requested, bm_cap) // 8) * 8)
    if batch >= 32:                                    # keep >= 4 grid steps
        bm = min(bm, max(8, _round_up(pl.cdiv(batch, 4), 8)))
    return min(bm, _round_up(batch, 8))


def metricnet_forward(x, packed_params, out_dim, *, block_b=1024,
                      vmem_limit_bytes=48 << 20, vmem_budget_bytes=40 << 20):
    w1, b1, w2, b2, w3, b3 = packed_params
    batch, feat = x.shape
    hidden = w1.shape[1]
    out_pad = w3.shape[1]

    param_bytes = sum(int(p.size) * p.dtype.itemsize for p in packed_params)
    # Constant-index_map inputs skip re-DMA but still get 2 VMEM buffers by
    # default; for large weights (matters on v7x's 64 MiB VMEM) use one buffer.
    single_buffer_weights = param_bytes >= (4 << 20)
    weight_buffers = 1 if single_buffer_weights else 2

    bm = _pick_block_b(block_b, batch, feat, hidden, out_pad,
                       param_bytes, weight_buffers, vmem_budget_bytes)
    grid_b = pl.cdiv(batch, bm)    # partial last block handled by Pallas masking

    def const_spec(shape):
        if single_buffer_weights:
            return pl.BlockSpec(shape, lambda i: (0, 0), pipeline_mode=pl.Buffered(1))
        return pl.BlockSpec(shape, lambda i: (0, 0))

    flops = 2 * batch * (feat * hidden + hidden * hidden + hidden * out_pad)
    bytes_accessed = (
        batch * feat * x.dtype.itemsize      # x streamed once, f32
        + param_bytes                        # resident weights/biases
        + batch * out_pad * 4                # narrow f32 output
    )

    out = pl.pallas_call(
        metricnet_kernel,
        out_shape=jax.ShapeDtypeStruct((batch, out_pad), jnp.float32),
        grid=(grid_b,),
        in_specs=[
            pl.BlockSpec((bm, feat), lambda i: (i, 0)),   # streamed f32 x tile
            const_spec((feat, hidden)),                   # resident weights / biases
            const_spec((1, hidden)),
            const_spec((hidden, hidden)),
            const_spec((1, hidden)),
            const_spec((hidden, out_pad)),
            const_spec((1, out_pad)),
        ],
        out_specs=pl.BlockSpec((bm, out_pad), lambda i: (i, 0)),
        compiler_params=pltpu.CompilerParams(
            dimension_semantics=("parallel",),
            vmem_limit_bytes=vmem_limit_bytes,
        ),
        cost_estimate=pl.CostEstimate(
            flops=flops, bytes_accessed=bytes_accessed, transcendentals=0),
    )(x, w1, b1, w2, b2, w3, b3)

    return out[:, :out_dim]


def reference_forward(x, params, compute_dtype=jnp.bfloat16):
    """Pure-JAX reference on the same bf16-rounded operands (f32 accumulation),
    matching the kernel's mixed-precision math."""
    w1, b1, w2, b2, w3, b3 = params

    def q(a):
        return a.astype(compute_dtype).astype(jnp.float32)

    h1 = jnp.maximum(jnp.dot(q(x), q(w1)) + b1, 0.0)
    h2 = jnp.maximum(jnp.dot(q(h1), q(w2)) + b2, 0.0)
    return jnp.dot(q(h2), q(w3)) + b3


if __name__ == "__main__":
    # Small shapes consistent with the module: in_dim=32 -> 64 input features,
    # hidden=32, batch=200 (not a multiple of the batch tile so the masked
    # partial tail block is exercised; grid ends up with 4 batch steps).
    in_dim = 32
    hidden_size = 32
    batch = 200

    key = jax.random.PRNGKey(0)
    kx, kp = jax.random.split(key)
    x = jax.random.normal(kx, (batch, 2 * in_dim), dtype=jnp.float32)
    params = init_params(kp, in_dim, hidden_size)

    packed, out_dim = pack_params(params, compute_dtype=jnp.bfloat16)
    out = metricnet_forward(x, packed, out_dim, block_b=1024)
    out = jax.block_until_ready(out)

    ref = reference_forward(x, params, compute_dtype=jnp.bfloat16)
    assert out.shape == (batch, 2), out.shape
    err = float(jnp.max(jnp.abs(out - ref)))
    assert jnp.allclose(out, ref, atol=1e-3, rtol=1e-3), err

    print("KERNEL_OK")
</pallas_src>

<mosaic_0001>
module attributes {stable_mosaic.version = 11 : i64} {
  func.func @metricnet_kernel(%arg0: i32, %arg1: memref<56x64xf32, #tpu.memory_space<vmem>>, %arg2: memref<64x128xbf16, #tpu.memory_space<vmem>>, %arg3: memref<1x128xf32, #tpu.memory_space<vmem>>, %arg4: memref<128x128xbf16, #tpu.memory_space<vmem>>, %arg5: memref<1x128xf32, #tpu.memory_space<vmem>>, %arg6: memref<128x8xbf16, #tpu.memory_space<vmem>>, %arg7: memref<1x8xf32, #tpu.memory_space<vmem>>, %arg8: memref<56x8xf32, #tpu.memory_space<vmem>>) attributes {dimension_semantics = [#tpu.dimension_semantics<parallel>], iteration_bounds = array<i64: 4>, scalar_prefetch = 0 : i64, scratch_operands = 0 : i64, tpu.core_type = #tpu.core_type<tc>, window_params = [{transform_indices = @transform_0, window_bounds = array<i64: 56, 64>}, {pipeline_mode = #tpu.pipeline_mode<synchronous>, transform_indices = @transform_1, window_bounds = array<i64: 64, 128>}, {pipeline_mode = #tpu.pipeline_mode<synchronous>, transform_indices = @transform_2, window_bounds = array<i64: 1, 128>}, {pipeline_mode = #tpu.pipeline_mode<synchronous>, transform_indices = @transform_3, window_bounds = array<i64: 128, 128>}, {pipeline_mode = #tpu.pipeline_mode<synchronous>, transform_indices = @transform_4, window_bounds = array<i64: 1, 128>}, {pipeline_mode = #tpu.pipeline_mode<synchronous>, transform_indices = @transform_5, window_bounds = array<i64: 128, 8>}, {pipeline_mode = #tpu.pipeline_mode<synchronous>, transform_indices = @transform_6, window_bounds = array<i64: 1, 8>}, {transform_indices = @transform_7, window_bounds = array<i64: 56, 8>}]} {
    %c0 = arith.constant 0 : index
    %c0_0 = arith.constant 0 : index
    %0 = vector.load %arg1[%c0, %c0_0] : memref<56x64xf32, #tpu.memory_space<vmem>>, vector<56x64xf32>
    %1 = arith.truncf %0 : vector<56x64xf32> to vector<56x64xbf16>
    %c0_1 = arith.constant 0 : index
    %c0_2 = arith.constant 0 : index
    %2 = vector.load %arg2[%c0_1, %c0_2] : memref<64x128xbf16, #tpu.memory_space<vmem>>, vector<64x128xbf16>
    %cst = arith.constant dense<0.000000e+00> : vector<56x128xf32>
    %3 = tpu.matmul %1, %2, %cst {dimension_numbers = #tpu.dot_dimension_numbers<[1], [0], [0], [1], [0, 0, 1, 1], [], []>} : vector<56x64xbf16>, vector<64x128xbf16>, vector<56x128xf32> -> vector<56x128xf32>
    %c0_3 = arith.constant 0 : index
    %c0_4 = arith.constant 0 : index
    %4 = vector.load %arg3[%c0_3, %c0_4] : memref<1x128xf32, #tpu.memory_space<vmem>>, vector<1x128xf32>
    %5 = vector.broadcast %4 : vector<1x128xf32> to vector<56x128xf32>
    %6 = arith.addf %3, %5 : vector<56x128xf32>
    %cst_5 = arith.constant 0.000000e+00 : f32
    %7 = vector.broadcast %cst_5 : f32 to vector<56x128xf32>
    %8 = arith.maximumf %6, %7 : vector<56x128xf32>
    %9 = arith.truncf %8 : vector<56x128xf32> to vector<56x128xbf16>
    %c0_6 = arith.constant 0 : index
    %c0_7 = arith.constant 0 : index
    %10 = vector.load %arg4[%c0_6, %c0_7] : memref<128x128xbf16, #tpu.memory_space<vmem>>, vector<128x128xbf16>
    %cst_8 = arith.constant dense<0.000000e+00> : vector<56x128xf32>
    %11 = tpu.matmul %9, %10, %cst_8 {dimension_numbers = #tpu.dot_dimension_numbers<[1], [0], [0], [1], [0, 0, 1, 1], [], []>} : vector<56x128xbf16>, vector<128x128xbf16>, vector<56x128xf32> -> vector<56x128xf32>
    %c0_9 = arith.constant 0 : index
    %c0_10 = arith.constant 0 : index
    %12 = vector.load %arg5[%c0_9, %c0_10] : memref<1x128xf32, #tpu.memory_space<vmem>>, vector<1x128xf32>
    %13 = vector.broadcast %12 : vector<1x128xf32> to vector<56x128xf32>
    %14 = arith.addf %11, %13 : vector<56x128xf32>
    %cst_11 = arith.constant 0.000000e+00 : f32
    %15 = vector.broadcast %cst_11 : f32 to vector<56x128xf32>
    %16 = arith.maximumf %14, %15 : vector<56x128xf32>
    %17 = arith.truncf %16 : vector<56x128xf32> to vector<56x128xbf16>
    %c0_12 = arith.constant 0 : index
    %c0_13 = arith.constant 0 : index
    %18 = vector.load %arg6[%c0_12, %c0_13] : memref<128x8xbf16, #tpu.memory_space<vmem>>, vector<128x8xbf16>
    %cst_14 = arith.constant dense<0.000000e+00> : vector<56x8xf32>
    %19 = tpu.matmul %17, %18, %cst_14 {dimension_numbers = #tpu.dot_dimension_numbers<[1], [0], [0], [1], [0, 0, 1, 1], [], []>} : vector<56x128xbf16>, vector<128x8xbf16>, vector<56x8xf32> -> vector<56x8xf32>
    %c0_15 = arith.constant 0 : index
    %c0_16 = arith.constant 0 : index
    %20 = vector.load %arg7[%c0_15, %c0_16] : memref<1x8xf32, #tpu.memory_space<vmem>>, vector<1x8xf32>
    %21 = vector.broadcast %20 : vector<1x8xf32> to vector<56x8xf32>
    %22 = arith.addf %19, %21 : vector<56x8xf32>
    %c0_17 = arith.constant 0 : index
    %c0_18 = arith.constant 0 : index
    %23 = vector.load %arg8[%c0_17, %c0_18] : memref<56x8xf32, #tpu.memory_space<vmem>>, vector<56x8xf32>
    tpu.vector_store %arg8[%c0_17, %c0_18], %22 {strides = array<i32>} : memref<56x8xf32, #tpu.memory_space<vmem>>, vector<56x8xf32>,
    return
  }
  func.func @transform_0(%arg0: i32) -> (i32, i32) {
    %c0_i32 = arith.constant 0 : i32
    %c0_i32_0 = arith.constant 0 : i32
    return %arg0, %c0_i32 : i32, i32
  }
  func.func @transform_1(%arg0: i32) -> (i32, i32) {
    %c0_i32 = arith.constant 0 : i32
    %c0_i32_0 = arith.constant 0 : i32
    %c0_i32_1 = arith.constant 0 : i32
    return %c0_i32, %c0_i32_0 : i32, i32
  }
  func.func @transform_2(%arg0: i32) -> (i32, i32) {
    %c0_i32 = arith.constant 0 : i32
    %c0_i32_0 = arith.constant 0 : i32
    %c0_i32_1 = arith.constant 0 : i32
    return %c0_i32, %c0_i32_0 : i32, i32
  }
  func.func @transform_3(%arg0: i32) -> (i32, i32) {
    %c0_i32 = arith.constant 0 : i32
    %c0_i32_0 = arith.constant 0 : i32
    %c0_i32_1 = arith.constant 0 : i32
    return %c0_i32, %c0_i32_0 : i32, i32
  }
  func.func @transform_4(%arg0: i32) -> (i32, i32) {
    %c0_i32 = arith.constant 0 : i32
    %c0_i32_0 = arith.constant 0 : i32
    %c0_i32_1 = arith.constant 0 : i32
    return %c0_i32, %c0_i32_0 : i32, i32
  }
  func.func @transform_5(%arg0: i32) -> (i32, i32) {
    %c0_i32 = arith.constant 0 : i32
    %c0_i32_0 = arith.constant 0 : i32
    %c0_i32_1 = arith.constant 0 : i32
    return %c0_i32, %c0_i32_0 : i32, i32
  }
  func.func @transform_6(%arg0: i32) -> (i32, i32) {
    %c0_i32 = arith.constant 0 : i32
    %c0_i32_0 = arith.constant 0 : i32
    %c0_i32_1 = arith.constant 0 : i32
    return %c0_i32, %c0_i32_0 : i32, i32
  }
  func.func @transform_7(%arg0: i32) -> (i32, i32) {
    %c0_i32 = arith.constant 0 : i32
    %c0_i32_0 = arith.constant 0 : i32
    return %arg0, %c0_i32 : i32, i32
  }
}

</mosaic_0001>

<bundles_post_ra>
// kernel: tpu_custom_call.1
= control target key start
LH: loop header
LB: loop body
LE: loop exit
PB: predicated region body
PF: predicated region fallthrough
CT: control target
= control target key end

     0   :  { %s1353_s24 = smov 0   ;;  %s1355_s25 = smov 0   ;;  %s1536_s0 = inlined_call_operand.vmem [shape: f32[200,64], index: 0, kind: input, shape index: {}]   ;;  %s1537_s1 = inlined_call_operand.vmem [shape: bf16[64,128], index: 1, kind: input, shape index: {}]   ;;  %s1538_s2 = inlined_call_operand.vmem [shape: f32[1,128], index: 2, kind: input, shape index: {}]   ;;  %s1539_s3 = inlined_call_operand.vmem [shape: bf16[128,128], index: 3, kind: input, shape index: {}]   ;;  %s1540_s4 = inlined_call_operand.vmem [shape: f32[1,128], index: 4, kind: input, shape index: {}]   ;;  %s1541_s5 = inlined_call_operand.vmem [shape: bf16[128,8], index: 5, kind: input, shape index: {}]   ;;  %s1542_s6 = inlined_call_operand.vmem [shape: f32[1,8], index: 6, kind: input, shape index: {}]   ;;  %s1543_s7 = inlined_call_operand.vmem [shape: f32[200,8], index: 7, kind: output, shape index: {}]  }
   0x1   :  { %s1357_s26 = smov 0  }
   0x2 LB: > { %s1366_s27 = sadd.s32 4294967295, %s1279_s26   ;;  %s1368_s28 = sadd.s32 1, %s1279_s26   ;;  %s1279_s26 = sphi %s1357_s26, %s1550_s26   ;;  %s1275_s25 = sphi %s1355_s25, %s1549_s25   ;;  %s1271_s24 = sphi %s1353_s24, %s1548_s24  }
   0x3   : > { %s173_s29 = ssub.s32 %s1279_s26, %s1368_s28  ;;  %s176_s30 = sadd.s32 1, %s1275_s25 }
   0x4   : > { %p174_p0 = scmp.eq.s32.totalorder %s173_s29, 0  ;;  %p186_p1 = scmp.ne.s32.totalorder %s1275_s25, %s1271_s24 }
   0x5   : > { %p187_p2 = scmp.eq.s32.totalorder %s1366_s27, 3  ;;  %p973_p3 = scmp.ge.s32.totalorder %s1279_s26, 1 }
   0x6   : > { %s1376_s8 = scalar_select %p174_p0, %s1275_s25, %s176_s30  }
   0x7   : > { %p1378_p4 = por %p187_p2, %p186_p1  ;;  %p246_p5 = scmp.lt.s32.totalorder %s1279_s26, 5 }
   0x9   : > { %p247_p6 = pnand %p973_p3, %p246_p5 }
   0xa   : > { %s1386_s12 = smul.u32 (!%p247_p6), 7, %s1366_s27  ;;  %s278_s11 = sand.u32 (!%p247_p6), 1, %s1271_s24  }
   0xb   : > { %250 = sbr.rel (%p247_p6) target bundleno = 708 (0x2c4), region = 48 }
   0xc   : > { %p286_p7 = scmp.lt.s32.totalorder (!%p247_p6), %s1386_s12, 24  ;;  %s1111_s13 = smul.u32 (!%p247_p6), 56, %s278_s11 }
   0xe   : > { %s1464_s16 = scalar_lea.vmem (!%p247_p6), [#allocation2], %s1111_s13  }
  0x10   : > { %v1201_v0 = vld [vmem:[%s1537_s1 + $0x18] sm:$0xff]   ;;  %v1202_v1 = vld [vmem:[%s1537_s1 + $0x10] sm:$0xff]   ;;  %v1203_v2 = vld [vmem:[%s1537_s1 + $0x8] sm:$0xff]   ;;  %s287_s17 = scalar_select %p286_p7, %s1386_s12, 24  ;;  %vm351_vm0 = vcmask 523264   ;;  %vm720_vm1 = vcmask 64512  }
  0x11   : > { %1047 = vmatprep.subr.bf16.mxu0 %v1201_v0  ;;  %v1205_v3 = vld [vmem:[%s1539_s3 + $0x38] sm:$0xff]   ;;  %v1206_v4 = vld [vmem:[%s1539_s3 + $0x30] sm:$0xff]   ;;  %v1204_v5 = vld [vmem:[%s1537_s1] sm:$0xff]   ;;  %s736_s24 = ssub.s32 (%p1378_p4), 25, %s1386_s12 }
  0x12   : > { %1048 = vmatpush3.bf16.msra.mxu0 %v1201_v0  ;;  %s974_s22 = sshll.u32 %s287_s17, 3  ;;  %1063 = vmatprep.subr.bf16.mxu1 %v1205_v3  ;;  %v1207_v11 = vld [vmem:[%s1539_s3 + $0x28] sm:$0xff]   ;;  %v1208_v14 = vld [vmem:[%s1539_s3 + $0x20] sm:$0xff]   ;;  %v1209_v17 = vld [vmem:[%s1539_s3 + $0x18] sm:$0xff]   ;;  %s1014_s17 = smul.u32 (%p1378_p4), 56, %s1366_s27 }
  0x13   : > { %1049 = vmatprep.subr.bf16.mxu0 %v1202_v1  ;;  %s289_s29 = scalar_lea.vmem %s1536_s0, %s974_s22  ;;  %1064 = vmatpush3.bf16.msra.mxu1 %v1205_v3  ;;  %v1210_v20 = vld [vmem:[%s1539_s3 + $0x10] sm:$0xff]   ;;  %v1211_v21 = vld [vmem:[%s1539_s3 + $0x8] sm:$0xff]   ;;  %v1212_v22 = vld [vmem:[%s1539_s3] sm:$0xff]   ;;  %p737_p8 = scmp.lt.s32.totalorder (%p1378_p4), %s736_s24, 7 }
  0x14   : > { %v301_v6 = vld [vmem:[%s289_s29] sm:$0xff]  ;;  %v302_v7 = vld [vmem:[%s289_s29 + $0x8] sm:$0xff]  ;;  %1065 = vmatprep.subr.bf16.mxu1 %v1206_v4  ;;  %v303_v9 = vld [vmem:[%s289_s29 + $0x10] sm:$0xff]  ;;  %s1487_s20 = scalar_lea.vmem (%p1378_p4), %s1543_s7, %s1014_s17  }
  0x15   : > { %v308_v8 = vpack.c.bf16 %v302_v7, %v301_v6  ;;  %v304_v10 = vld [vmem:[%s289_s29 + $0x18] sm:$0xff]  ;;  %v305_v12 = vld [vmem:[%s289_s29 + $0x20] sm:$0xff]  ;;  %v306_v13 = vld [vmem:[%s289_s29 + $0x28] sm:$0xff] }
  0x16   : > { %1050 = vmatpush3.bf16.msra.mxu0 %v1202_v1  ;;  %v309_v15 = vpack.c.bf16 %v304_v10, %v303_v9  ;;  %v310_v16 = vpack.c.bf16 %v306_v13, %v305_v12  ;;  %v307_v18 = vld [vmem:[%s289_s29 + $0x30] sm:$0xff]  ;;  %v1213_v23 = vld [vmem:[%s1541_s5 + $0x38] sm:$0xff]   ;;  %v1215_v25 = vld [vmem:[%s1541_s5 + $0x28] sm:$0xff]  }
  0x17   : > { %1051 = vmatprep.subr.bf16.mxu0 %v1203_v2  ;;  %1055 = vmatprep.mubr.msk.bf16.mxu0 %vm351_vm0, %v308_v8  ;;  %v311_v19 = vpack.c.bf16 %v307_v18, %v307_v18  ;;  %v1214_v24 = vld [vmem:[%s1541_s5 + $0x30] sm:$0xff]   ;;  %v1216_v26 = vld [vmem:[%s1541_s5 + $0x20] sm:$0xff]   ;;  %v1217_v27 = vld [vmem:[%s1541_s5 + $0x18] sm:$0xff]  }
  0x18   : > { %1066 = vmatpush3.bf16.msra.mxu1 %v1206_v4  ;;  %v975_v30 = vld [vmem:[%s1538_s2] ss:$0 sm:$0xff]  ;;  %v1218_v55 = vld [vmem:[%s1541_s5 + $0x10] sm:$0xff]   ;;  %v1219_v56 = vld [vmem:[%s1541_s5 + $0x8] sm:$0xff]  }
  0x19   : > { %1067 = vmatprep.subr.bf16.mxu1 %v1207_v11  ;;  %v1220_v57 = vld [vmem:[%s1541_s5] sm:$0xff]  }
  0x1a   : > { %1052 = vmatpush3.bf16.msra.mxu0 %v1203_v2  ;;  %v984_v60 = vld [vmem:[%s1540_s4] ss:$0 sm:$0xff] }
  0x1b   : > { %1053 = vmatprep.subr.bf16.mxu0 %v1204_v5 }
  0x1c   : > { %1068 = vmatpush3.bf16.msra.mxu1 %v1207_v11 }
  0x1d   : > { %1069 = vmatprep.subr.bf16.mxu1 %v1208_v14 }
  0x1e   : > { %1054 = vmatpush3.bf16.msra.mxu0 %v1204_v5 }
  0x1f   : > { %1087 = vmatprep.subr.bf16.mxu0 %v1213_v23 }
  0x20   : > { %1070 = vmatpush3.bf16.msra.mxu1 %v1208_v14 }
  0x21   : > { %1056 = vmatmul.mubr.msk.bf16.vlgmr.msra.gmra.mxu0 %vm351_vm0, %v309_v15  ;;  %1071 = vmatprep.subr.bf16.mxu1 %v1209_v17 }
  0x22   : > { %1059 = vmatprep.mubr.msk.bf16.mxu0 %vm351_vm0, %v310_v16  ;;  %1088 = vmatpush3.bf16.msra.mxu0 %v1213_v23 }
  0x23   : > { %1089 = vmatprep.subr.bf16.mxu0 %v1214_v24 }
  0x24   : > { %1072 = vmatpush3.bf16.msra.mxu1 %v1209_v17 }
  0x25   : > { %1073 = vmatprep.subr.bf16.mxu1 %v1210_v20 }
  0x26   : > { %1090 = vmatpush3.bf16.msra.mxu0 %v1214_v24 }
  0x27   : > { %1091 = vmatprep.subr.bf16.mxu0 %v1215_v25 }
  0x28   : > { %1074 = vmatpush3.bf16.msra.mxu1 %v1210_v20 }
  0x29   : > { %1060 = vmatmul.mubr.msk.bf16.gmra.mxu0 %vm351_vm0, %v311_v19  ;;  %1075 = vmatprep.subr.bf16.mxu1 %v1211_v21 }
  0x2a   : > { %1092 = vmatpush3.bf16.msra.mxu0 %v1215_v25 }
  0x2b   : > { %1093 = vmatprep.subr.bf16.mxu0 %v1216_v26 }
  0x2c   : > { %1076 = vmatpush3.bf16.msra.mxu1 %v1211_v21  ;;  %v993_v21 = vld [vmem:[%s1542_s6] ss:$0 sm:$0xff] }
  0x2d   : > { %1077 = vmatprep.subr.bf16.mxu1 %v1212_v22 }
  0x2e   : > { %1094 = vmatpush3.bf16.msra.mxu0 %v1216_v26 }
  0x2f   : > { %1095 = vmatprep.subr.bf16.mxu0 %v1217_v27 }
  0x30   : > { %1078 = vmatpush3.bf16.msra.mxu1 %v1212_v22 }
  0x32   : > { %1096 = vmatpush3.bf16.msra.mxu0 %v1217_v27 }
  0x33   : > { %1097 = vmatprep.subr.bf16.mxu0 %v1218_v55 }
  0x36   : > { %1098 = vmatpush3.bf16.msra.mxu0 %v1218_v55 }
  0x37   : > { %1099 = vmatprep.subr.bf16.mxu0 %v1219_v56 }
  0x3a   : > { %1100 = vmatpush3.bf16.msra.mxu0 %v1219_v56 }
  0x3b   : > { %1101 = vmatprep.subr.bf16.mxu0 %v1220_v57 }
  0x3e   : > { %1102 = vmatpush3.bf16.msra.mxu0 %v1220_v57 }
  0xe1   : > { %v1057_v28 = vpop.f32.mrf.mxu0 }
  0xe2   : > { %v407_v34 = vadd.f32 %v1057_v28, %v975_v30 }
  0xe3   : > { %v398_v29 = vpop.f32.mrf.mxu0 }
  0xe4   : > { %v399_v32 = vadd.f32 %v975_v30, %v398_v29  ;;  %v430_v41 = vmax.f32 %v407_v34, 0.0 }
  0xe5   : > { %v1058_v31 = vpop.f32.mrf.mxu0 }
  0xe6   : > { %v410_v33 = vadd.f32 %v1058_v31, %v975_v30  ;;  %v428_v39 = vmax.f32 %v399_v32, 0.0 }
  0xe7   : > { %v401_v35 = vpop.f32.mrf.mxu0 }
  0xe8   : > { %v402_v36 = vadd.f32 %v975_v30, %v401_v35  ;;  %v431_v37 = vmax.f32 %v410_v33, 0.0 }
  0xe9   : > { %v1061_v38 = vpop.f32.mrf.mxu0 }
  0xea   : > { %v429_v40 = vmax.f32 %v402_v36, 0.0  ;;  %v436_v44 = vpack.c.bf16 %v431_v37, %v430_v41  ;;  %v423_v45 = vadd.f32 %v1061_v38, %v975_v30 }
  0xeb   : > { %v414_v42 = vpop.f32.mrf.mxu0 }
  0xec   : > { %v435_v43 = vpack.c.bf16 %v429_v40, %v428_v39  ;;  %v415_v47 = vadd.f32 %v975_v30, %v414_v42  ;;  %v434_v50 = vmax.f32 %v423_v45, 0.0 }
  0xed   : > { %v1062_v46 = vpop.f32.mrf.mxu0 }
  0xee   : > { %1079 = vmatprep.mubr.bf16.mxu1 %v435_v43  ;;  %v432_v51 = vmax.f32 %v415_v47, 0.0  ;;  %v438_v54 = vpack.c.bf16 %v434_v50, %v434_v50 }
  0xef   : > { %v417_v48 = vpop.f32.mrf.mxu0  ;;  %1080 = vmatmul.mubr.bf16.vlgmr.msra.gmra.mxu1 %v436_v44 }
  0xf0   : > { %v418_v49 = vadd.f32 %v975_v30, %v417_v48 }
  0xf2   : > { %v433_v52 = vmax.f32 %v418_v49, 0.0 }
  0xf4   : > { %v437_v53 = vpack.c.bf16 %v433_v52, %v432_v51 }
  0xf6   : > { %1083 = vmatprep.mubr.bf16.mxu1 %v437_v53 }
  0xf7   : > { %1084 = vmatmul.mubr.bf16.gmra.mxu1 %v438_v54 }
 0x1af   : > { %v1081_v58 = vpop.f32.mrf.mxu1 }
 0x1b0   : > { %v553_v0 = vadd.f32 %v1081_v58, %v984_v60 }
 0x1b1   : > { %v544_v59 = vpop.f32.mrf.mxu1 }
 0x1b2   : > { %v545_v62 = vadd.f32 %v984_v60, %v544_v59  ;;  %v576_v7 = vmax.f32 %v553_v0, 0.0 }
 0x1b3   : > { %v1082_v61 = vpop.f32.mrf.mxu1 }
 0x1b4   : > { %v556_v63 = vadd.f32 %v1082_v61, %v984_v60  ;;  %v574_v5 = vmax.f32 %v545_v62, 0.0 }
 0x1b5   : > { %v547_v1 = vpop.f32.mrf.mxu1 }
 0x1b6   : > { %v548_v2 = vadd.f32 %v984_v60, %v547_v1  ;;  %v577_v3 = vmax.f32 %v556_v63, 0.0 }
 0x1b7   : > { %v1085_v4 = vpop.f32.mrf.mxu1 }
 0x1b8   : > { %v575_v6 = vmax.f32 %v548_v2, 0.0  ;;  %v582_v10 = vpack.c.bf16 %v577_v3, %v576_v7  ;;  %v569_v11 = vadd.f32 %v1085_v4, %v984_v60 }
 0x1b9   : > { %v560_v8 = vpop.f32.mrf.mxu1 }
 0x1ba   : > { %v581_v9 = vpack.c.bf16 %v575_v6, %v574_v5  ;;  %v561_v13 = vadd.f32 %v984_v60, %v560_v8  ;;  %v580_v16 = vmax.f32 %v569_v11, 0.0 }
 0x1bb   : > { %v1086_v12 = vpop.f32.mrf.mxu1 }
 0x1bc   : > { %1103 = vmatprep.mubr.bf16.mxu0 %v581_v9  ;;  %v578_v17 = vmax.f32 %v561_v13, 0.0  ;;  %v584_v20 = vpack.c.bf16 %v580_v16, %v580_v16 }
 0x1bd   : > { %v563_v14 = vpop.f32.mrf.mxu1  ;;  %1104 = vmatmul.mubr.bf16.vlgmr.msra.gmra.mxu0 %v582_v10 }
 0x1be   : > { %v564_v15 = vadd.f32 %v984_v60, %v563_v14 }
 0x1c0   : > { %v579_v18 = vmax.f32 %v564_v15, 0.0 }
 0x1c2   : > { %v583_v19 = vpack.c.bf16 %v579_v18, %v578_v17 }
 0x1c4   : > { %1107 = vmatprep.mubr.bf16.mxu0 %v583_v19 }
 0x1c5   : > { %1108 = vmatmul.mubr.bf16.gmra.mxu0 %v584_v20 }
 0x27d   : > { %v1105_v22 = vpop.f32.mrf.mxu0 }
 0x27e   : > { %v699_v23 = vadd.f32 %v1105_v22, %v993_v21 }
 0x27f   : > { %v690_v24 = vpop.f32.mrf.mxu0 }
 0x280   : > { %723 = vst.msk [vmem:[%s1464_s16 + $0x10] sm:$0xff] %vm720_vm1, %v699_v23  ;;  %v691_v25 = vadd.f32 %v993_v21, %v690_v24 }
 0x281   : > { %v1106_v26 = vpop.f32.mrf.mxu0 }
 0x282   : > { %721 = vst.msk [vmem:[%s1464_s16] sm:$0xff] %vm720_vm1, %v691_v25  ;;  %v702_v27 = vadd.f32 %v1106_v26, %v993_v21 }
 0x283   : > { %v693_v28 = vpop.f32.mrf.mxu0 }
 0x284   : > { %724 = vst.msk [vmem:[%s1464_s16 + $0x18] sm:$0xff] %vm720_vm1, %v702_v27  ;;  %v694_v29 = vadd.f32 %v993_v21, %v693_v28 }
 0x285   : > { %v1109_v30 = vpop.f32.mrf.mxu0 }
 0x286   : > { %722 = vst.msk [vmem:[%s1464_s16 + $0x8] sm:$0xff] %vm720_vm1, %v694_v29  ;;  %v715_v31 = vadd.f32 %v1109_v30, %v993_v21 }
 0x287   : > { %v706_v32 = vpop.f32.mrf.mxu0 }
 0x288   : > { %727 = vst.msk [vmem:[%s1464_s16 + $0x30] sm:$0xff] %vm720_vm1, %v715_v31  ;;  %v707_v33 = vadd.f32 %v993_v21, %v706_v32 }
 0x289   : > { %v1110_v34 = vpop.f32.mrf.mxu0 }
 0x28a   : > { %725 = vst.msk [vmem:[%s1464_s16 + $0x20] sm:$0xff] %vm720_vm1, %v707_v33  ;;  %734 = sbr.rel (!%p1378_p4) target bundleno = 708 (0x2c4), region = 52 }
 0x28b   : > { %v709_v35 = vpop.f32.mrf.mxu0 }
 0x28c   : > { %v710_v36 = vadd.f32 %v993_v21, %v709_v35 }
 0x28e   : > { %726 = vst.msk [vmem:[%s1464_s16 + $0x28] sm:$0xff] %vm720_vm1, %v710_v36 }
 0x28f   : > { %s1552_s24 = smov (!%p737_p8, %s736_s24), 7 }
 0x290   : > { %s1002_s21 = sshll.u32 %s1552_s24, 7 }
 0x291   : > { %p1005_p9 = scmp.eq.s32.totalorder %s1002_s21, 0 }
 0x292   : > { %1221 = sdivrem.u32 (!%p1005_p9), %s1552_s24, 7 }
 0x293   : > { %745 = sbr.rel (%p1005_p9) target bundleno = 708 (0x2c4), region = 56 }
 0x29b   : > { %s1493_s9 = spop.drf %1221 }
 0x29c   : > { %p1006_p10 = scmp.le.s32.totalorder %s1493_s9, 0 }
 0x29d   : > { %s1545_s27 = smov (!%p1006_p10), %s1487_s20  ;;  %s1546_s12 = smov (!%p1006_p10), %s1464_s16 }
 0x29e   : > { %926 = sbr.rel (%p1006_p10) target bundleno = 683 (0x2ab), region = 132  ;;  %s1502_s22 = smov (!%p1006_p10), 0  }
 0x29f   : > { %s1504_s23 = smov (!%p1006_p10), 0  }
 0x2a3 LB: >> { %v822_v37 = vld [vmem:[%s1287_s12] sm:$0xff]  ;;  %v824_v38 = vld [vmem:[%s1287_s12 + $0x8] sm:$0xff]  ;;  %v826_v39 = vld [vmem:[%s1287_s12 + $0x10] sm:$0xff]  ;;  %s836_s26 = sadd.s32 1, %s1291_s22  ;;  %s816_s23 = sadd.s32 1, %s1295_s23   ;;  %s1295_s23 = sphi %s1504_s23, %s816_s23   ;;  %s1291_s22 = sphi %s1502_s22, %s1547_s22   ;;  %s1287_s12 = sphi %s1546_s12, %s841_s12   ;;  %s1283_s27 = sphi %s1545_s27, %s842_s27  }
 0x2a4   : >> { %823 = vst [vmem:[%s1283_s27] sm:$0xff] %v822_v37  ;;  %825 = vst [vmem:[%s1283_s27 + $0x8] sm:$0xff] %v824_v38  ;;  %v828_v40 = vld [vmem:[%s1287_s12 + $0x18] sm:$0xff]  ;;  %v830_v41 = vld [vmem:[%s1287_s12 + $0x20] sm:$0xff]  ;;  %p837_p11 = scmp.ge.s32.totalorder %s836_s26, %s1493_s9  ;;  %p815_p12 = scmp.ge.s32.totalorder %s816_s23, %s1493_s9 }
 0x2a5   : >> { %827 = vst [vmem:[%s1283_s27 + $0x10] sm:$0xff] %v826_v39  ;;  %v832_v42 = vld [vmem:[%s1287_s12 + $0x28] sm:$0xff]  ;;  %829 = vst [vmem:[%s1283_s27 + $0x18] sm:$0xff] %v828_v40  ;;  %v834_v43 = vld [vmem:[%s1287_s12 + $0x30] sm:$0xff] }
 0x2a6   : >> { %831 = vst [vmem:[%s1283_s27 + $0x20] sm:$0xff] %v830_v41  ;;  %833 = vst [vmem:[%s1283_s27 + $0x28] sm:$0xff] %v832_v42  ;;  %s1554_s26 = smov (%p837_p11, %s836_s26), 0  ;;  %818 = sbr.rel (!%p815_p12) target bundleno = 675 (0x2a3), region = 138 }
 0x2a7   : >> { %835 = vst [vmem:[%s1283_s27 + $0x30] sm:$0xff] %v834_v43  ;;  %s839_s29 = smul.u32 56, %s1554_s26  ;;  %s1547_s22 = smov %s1554_s26 }
 0x2a9   : >> { %s841_s12 = scalar_lea.vmem %s1464_s16, %s839_s29 [#allocation2]   ;;  %s842_s27 = scalar_lea.vmem %s1487_s20, %s839_s29  }
 0x2ab PF: > { %1223 = sdivrem.u32 %s1552_s24, 7 }
 0x2ac   : > { %s1007_s30 = smul.u32 56, %s1493_s9 }
 0x2ae   : > { %s847_s10 = scalar_lea.vmem %s1464_s16, %s1007_s30 [#allocation2]   ;;  %s849_s11 = scalar_lea.vmem %s1487_s20, %s1007_s30  }
 0x2b4   : > { %s1224_s13 = spop.drf %1223 }
 0x2b5   : > { %p1009_p13 = scmp.le.s32.totalorder %s1224_s13, 0 }
 0x2b6   : > { %s1297_s14 = smov (!%p1009_p13), %s849_s11   ;;  %s1301_s15 = smov (!%p1009_p13), %s847_s10  }
 0x2b7   : > { %940 = sbr.rel (%p1009_p13) target bundleno = 708 (0x2c4), region = 143  ;;  %s1305_s17 = smov (!%p1009_p13), 0  }
 0x2b8   : > { %s1309_s18 = smov (!%p1009_p13), 0  }
 0x2bc LB: >> { %v859_v44 = vld [vmem:[%s1303_s15] sm:$0xff]  ;;  %s861_s19 = sadd.s32 1, %s1307_s17  ;;  %s853_s18 = sadd.s32 1, %s1311_s18   ;;  %s1311_s18 = sphi %s1309_s18, %s853_s18   ;;  %s1307_s17 = sphi %s1305_s17, %s1306_s17   ;;  %s1303_s15 = sphi %s1301_s15, %s866_s15   ;;  %s1299_s14 = sphi %s1297_s14, %s867_s14  }
 0x2bd   : >> { %860 = vst [vmem:[%s1299_s14] sm:$0xff] %v859_v44  ;;  %p862_p0 = scmp.ge.s32.totalorder %s861_s19, %s1224_s13  ;;  %p852_p1 = scmp.ge.s32.totalorder %s853_s18, %s1224_s13 }
 0x2bf   : >> { %s1556_s19 = smov (%p862_p0, %s861_s19), 0  ;;  %855 = sbr.rel (!%p852_p1) target bundleno = 700 (0x2bc), region = 149 }
 0x2c0   : >> { %s1010_s16 = sshll.u32 %s1556_s19, 3  ;;  %s1306_s17 = smov %s1556_s19  }
 0x2c1   : >> { %s866_s15 = scalar_lea.vmem %s847_s10, %s1010_s16 [#allocation2]   ;;  %s867_s14 = scalar_lea.vmem %s849_s11, %s1010_s16  }
 0x2c4 PF: > { %p14_p2 = scmp.ge.s32.totalorder %s1368_s28, 6   ;;  %s1548_s24 = smov %s1275_s25 }
 0x2c5   : > { %s1549_s25 = smov %s1376_s8  ;;  %s1550_s26 = smov %s1368_s28 }
 0x2c6   :  { %16 = sbr.rel (!%p14_p2) target bundleno = 2 (0x2), region = 160 }

</bundles_post_ra>
